<compile_context>
chip_gen: v7x
topology: tpu7x:2x2x1
jax: 0.10.0
libtpu: 0.0.40
codegen_flags: <defaults>
</compile_context>

<pallas_src>
import jax
import jax.numpy as jnp
from jax import lax
from jax.experimental import pallas as pl
from jax.experimental.pallas import tpu as pltpu


def _vmem_limit_bytes():
    # Per-generation scoped-VMEM limit with ~25% headroom; conservative
    # fallback that is safe on every generation (v7x physical VMEM = 64 MiB).
    try:
        return int(pltpu.get_tpu_info().vmem_capacity_bytes * 3 // 4)
    except Exception:
        return 48 * 1024 * 1024


def _pick_tile(n, target):
    """Largest multiple of 128 that divides n and is <= max(target, 128)."""
    target = max(128, min(n, target))
    t = (target // 128) * 128
    while t > 128 and n % t != 0:
        t -= 128
    return t


# ----------------------------------------------------------------------------
# Kernels
# ----------------------------------------------------------------------------
def _hop1_kernel(a_ref, xk_ref, xi_ref, w1_ref, b1_ref, wfc_ref,
                 h_ref, seq_ref, acc_ref):
    # Accumulate AX = A[i-tile, :] @ X over the K (reduction) grid axis; on the
    # last K step apply the tiny dense layer:  h = relu(AX @ W1 + b1)
    # (== relu(A @ (X @ W1) + b1) by associativity), and emit the fused
    # nn.Linear head seq_fts = X_row @ Wfc^T.
    k = pl.program_id(1)

    @pl.when(k == 0)
    def _():
        acc_ref[...] = jnp.zeros_like(acc_ref)

    acc_ref[...] += jnp.dot(a_ref[...], xk_ref[...],
                            preferred_element_type=jnp.float32)

    @pl.when(k == pl.num_programs(1) - 1)
    def _():
        ax = acc_ref[...]
        h = jnp.maximum(
            jnp.dot(ax, w1_ref[...], preferred_element_type=jnp.float32)
            + b1_ref[...], 0.0)
        h_ref[...] = h.astype(h_ref.dtype)            # stored bf16 for hop 2
        seq_ref[...] = jnp.dot(xi_ref[...], wfc_ref[...],
                               preferred_element_type=jnp.float32)


def _hop2_kernel(a_ref, h_ref, w2_ref, b2_ref, w3_ref, b3_ref, noise_ref,
                 z_ref, acc_ref):
    # Accumulate AH = A[i-tile, :] @ h over K; on the last K step apply W2/W3
    # (mean / log_std branches share the single A-matmul) and reparameterize.
    k = pl.program_id(1)

    @pl.when(k == 0)
    def _():
        acc_ref[...] = jnp.zeros_like(acc_ref)

    acc_ref[...] += jnp.dot(a_ref[...], h_ref[...],
                            preferred_element_type=jnp.float32)

    @pl.when(k == pl.num_programs(1) - 1)
    def _():
        ah = acc_ref[...]
        mean = jnp.maximum(
            jnp.dot(ah, w2_ref[...], preferred_element_type=jnp.float32)
            + b2_ref[...], 0.0)
        log_std = jnp.maximum(
            jnp.dot(ah, w3_ref[...], preferred_element_type=jnp.float32)
            + b3_ref[...], 0.0)
        z_ref[...] = mean + noise_ref[...] * jnp.exp(log_std)


def _decoder_kernel(zi_ref, zj_ref, adj_ref):
    # sigmoid(z_i @ z_j^T) without materializing a transpose; sigmoid is
    # exp (EUP) + approximate reciprocal (EUP) so the VPU/store path stays free
    # for the N^2 writeback that bounds this kernel.
    s = lax.dot_general(zi_ref[...], zj_ref[...],
                        dimension_numbers=(((1,), (1,)), ((), ())),
                        preferred_element_type=jnp.float32)
    adj_ref[...] = pl.reciprocal(1.0 + jnp.exp(-s), approx=True)


# ----------------------------------------------------------------------------
# Wrapper
# ----------------------------------------------------------------------------
def gae_lp_forward(a_hat, x, params, noise, *, tm=256, tk=1024,
                   tm_decoder=256, tn_decoder=512):
    n, in_dim = x.shape
    hidden_dim = params["w1"].shape[1]
    out_dim = params["w3"].shape[1]
    # The PyTorch reference's `mean + noise * exp(log_std)` broadcast requires:
    assert hidden_dim == out_dim, "GAE_LP forward requires hidden_dim == out_dim"
    assert n % 128 == 0, "demo wrapper assumes N is a multiple of 128"

    # Keep >= 2 steps on the leading 'parallel' axis so both TensorCores of a
    # v7x megacore get work; the reduction tile tk just bounds VMEM.
    tm = _pick_tile(n, min(tm, max(128, n // 2)))
    tk = _pick_tile(n, tk)
    tm_d = _pick_tile(n, min(tm_decoder, max(128, n // 2)))
    tn_d = _pick_tile(n, tn_decoder)

    f32 = jnp.float32
    bf16 = jnp.bfloat16

    # bf16 copies of the streamed operands of the two HBM-bound hop kernels
    # (accumulation stays f32 on the MXU).  In a real pipeline A_hat would be
    # stored in bf16 once so this cast is amortized.
    a_bf16 = a_hat.astype(bf16)
    x_bf16 = x.astype(bf16)

    vmem_limit = _vmem_limit_bytes()
    cp_hop = pltpu.CompilerParams(
        dimension_semantics=("parallel", "arbitrary"),
        vmem_limit_bytes=vmem_limit)
    cp_dec = pltpu.CompilerParams(
        dimension_semantics=("parallel", "parallel"),
        vmem_limit_bytes=vmem_limit)

    grid_hop = (n // tm, n // tk)

    # --- hop 1: h = relu((A @ X) @ W1 + b1), fused seq_fts = X @ Wfc^T -------
    h_bf16, seq_fts = pl.pallas_call(
        _hop1_kernel,
        grid=grid_hop,
        in_specs=[
            pl.BlockSpec((tm, tk), lambda i, k: (i, k)),          # A (bf16)
            pl.BlockSpec((tk, in_dim), lambda i, k: (k, 0)),      # X (bf16), K tile
            pl.BlockSpec((tm, in_dim), lambda i, k: (i, 0)),      # X (f32), row tile
            pl.BlockSpec((in_dim, hidden_dim), lambda i, k: (0, 0)),
            pl.BlockSpec((1, hidden_dim), lambda i, k: (0, 0)),
            pl.BlockSpec((in_dim, out_dim), lambda i, k: (0, 0)),
        ],
        out_specs=(
            pl.BlockSpec((tm, hidden_dim), lambda i, k: (i, 0)),
            pl.BlockSpec((tm, out_dim), lambda i, k: (i, 0)),
        ),
        out_shape=(
            jax.ShapeDtypeStruct((n, hidden_dim), bf16),
            jax.ShapeDtypeStruct((n, out_dim), f32),
        ),
        scratch_shapes=[pltpu.VMEM((tm, in_dim), f32)],
        compiler_params=cp_hop,
        cost_estimate=pl.CostEstimate(
            flops=2 * n * n * in_dim
                  + 2 * n * in_dim * (hidden_dim + out_dim),
            transcendentals=0,
            bytes_accessed=2 * n * n + 6 * n * in_dim
                           + 2 * n * hidden_dim + 4 * n * out_dim),
    )(a_bf16, x_bf16, x, params["w1"], params["b1"], params["wfc_t"])

    # --- hop 2: AH = A @ h, then mean/log_std + reparameterization -----------
    z = pl.pallas_call(
        _hop2_kernel,
        grid=grid_hop,
        in_specs=[
            pl.BlockSpec((tm, tk), lambda i, k: (i, k)),          # A (bf16)
            pl.BlockSpec((tk, hidden_dim), lambda i, k: (k, 0)),  # h (bf16), K tile
            pl.BlockSpec((hidden_dim, hidden_dim), lambda i, k: (0, 0)),
            pl.BlockSpec((1, hidden_dim), lambda i, k: (0, 0)),
            pl.BlockSpec((hidden_dim, out_dim), lambda i, k: (0, 0)),
            pl.BlockSpec((1, out_dim), lambda i, k: (0, 0)),
            pl.BlockSpec((tm, out_dim), lambda i, k: (i, 0)),     # noise, row tile
        ],
        out_specs=pl.BlockSpec((tm, out_dim), lambda i, k: (i, 0)),
        out_shape=jax.ShapeDtypeStruct((n, out_dim), f32),
        scratch_shapes=[pltpu.VMEM((tm, hidden_dim), f32)],
        compiler_params=cp_hop,
        cost_estimate=pl.CostEstimate(
            flops=2 * n * n * hidden_dim
                  + 2 * n * hidden_dim * (hidden_dim + out_dim),
            transcendentals=n * out_dim,
            bytes_accessed=2 * n * n + 2 * n * hidden_dim + 8 * n * out_dim),
    )(a_bf16, h_bf16, params["w2"], params["b2"], params["w3"], params["b3"],
      noise)

    # --- decoder: adj_rec = sigmoid(z @ z^T), lane-dense 2-D output tiles ----
    adj_rec = pl.pallas_call(
        _decoder_kernel,
        grid=(n // tm_d, n // tn_d),
        in_specs=[
            pl.BlockSpec((tm_d, out_dim), lambda i, j: (i, 0)),
            pl.BlockSpec((tn_d, out_dim), lambda i, j: (j, 0)),
        ],
        out_specs=pl.BlockSpec((tm_d, tn_d), lambda i, j: (i, j)),
        out_shape=jax.ShapeDtypeStruct((n, n), f32),
        compiler_params=cp_dec,
        cost_estimate=pl.CostEstimate(
            flops=2 * n * n * out_dim,
            transcendentals=2 * n * n,
            bytes_accessed=4 * (2 * n * out_dim + n * n)),
    )(z, z)

    return adj_rec, z, seq_fts


# ----------------------------------------------------------------------------
# Reference (pure JAX, f32) and demo
# ----------------------------------------------------------------------------
def reference_forward(a_hat, x, params, noise):
    h = jax.nn.relu(a_hat @ (x @ params["w1"]) + params["b1"])
    mean = jax.nn.relu(a_hat @ (h @ params["w2"]) + params["b2"])
    log_std = jax.nn.relu(a_hat @ (h @ params["w3"]) + params["b3"])
    z = mean + noise * jnp.exp(log_std)
    adj_rec = jax.nn.sigmoid(z @ z.T)
    seq_fts = x @ params["wfc_t"]
    return adj_rec, z, seq_fts


def make_normalized_adjacency(key, n):
    # random undirected graph; DGL GraphConv norm='both', degrees clamped >= 1
    a = jax.random.bernoulli(key, p=0.1, shape=(n, n)).astype(jnp.float32)
    a = jnp.triu(a, k=1)
    a = a + a.T
    deg = jnp.clip(a.sum(axis=1), 1.0, None)
    d_inv_sqrt = 1.0 / jnp.sqrt(deg)
    return d_inv_sqrt[:, None] * a * d_inv_sqrt[None, :]


if __name__ == "__main__":
    # hidden_dim must equal out_dim (required by the reference module's
    # broadcast in encoder_VGAE).
    N, in_dim, hidden_dim, out_dim = 256, 16, 32, 32

    key = jax.random.PRNGKey(0)
    k_adj, k_x, k_w1, k_w2, k_w3, k_fc, k_noise = jax.random.split(key, 7)

    a_hat = make_normalized_adjacency(k_adj, N)
    x = jax.random.normal(k_x, (N, in_dim), dtype=jnp.float32)

    params = {
        "w1": 0.1 * jax.random.normal(k_w1, (in_dim, hidden_dim), jnp.float32),
        "b1": jnp.zeros((1, hidden_dim), jnp.float32),
        "w2": 0.1 * jax.random.normal(k_w2, (hidden_dim, hidden_dim), jnp.float32),
        "b2": jnp.zeros((1, hidden_dim), jnp.float32),
        "w3": 0.1 * jax.random.normal(k_w3, (hidden_dim, out_dim), jnp.float32),
        "b3": jnp.zeros((1, out_dim), jnp.float32),
        # nn.Linear(in_dim, out_dim, bias=False): weight is (out, in); pass W.T
        "wfc_t": 0.1 * jax.random.normal(k_fc, (in_dim, out_dim), jnp.float32),
    }
    noise = jax.random.normal(k_noise, (N, out_dim), dtype=jnp.float32)

    adj_rec, z, seq_fts = gae_lp_forward(a_hat, x, params, noise)
    jax.block_until_ready((adj_rec, z, seq_fts))

    assert adj_rec.shape == (N, N)
    assert z.shape == (N, out_dim)
    assert seq_fts.shape == (N, out_dim)

    # numerical sanity check vs the f32 pure-JAX reference (tolerance covers
    # the bf16 streaming of A/h and MXU-vs-XLA f32 differences)
    adj_ref, z_ref, seq_ref = reference_forward(a_hat, x, params, noise)
    assert jnp.allclose(adj_rec, adj_ref, rtol=2e-2, atol=2e-2)
    assert jnp.allclose(z, z_ref, rtol=2e-2, atol=2e-2)
    assert jnp.allclose(seq_fts, seq_ref, rtol=2e-2, atol=2e-2)

    print("KERNEL_OK")
</pallas_src>

<mosaic_0001>
module attributes {stable_mosaic.version = 11 : i64} {
  func.func @_hop1_kernel(%arg0: i32, %arg1: i32, %arg2: memref<128x256xbf16, #tpu.memory_space<vmem>>, %arg3: memref<256x16xbf16, #tpu.memory_space<vmem>>, %arg4: memref<128x16xf32, #tpu.memory_space<vmem>>, %arg5: memref<16x32xf32, #tpu.memory_space<vmem>>, %arg6: memref<1x32xf32, #tpu.memory_space<vmem>>, %arg7: memref<16x32xf32, #tpu.memory_space<vmem>>, %arg8: memref<128x32xbf16, #tpu.memory_space<vmem>>, %arg9: memref<128x32xf32, #tpu.memory_space<vmem>>, %arg10: memref<128x16xf32, #tpu.memory_space<vmem>>) attributes {dimension_semantics = [#tpu.dimension_semantics<parallel>, #tpu.dimension_semantics<arbitrary>], iteration_bounds = array<i64: 2, 1>, scalar_prefetch = 0 : i64, scratch_operands = 1 : i64, tpu.core_type = #tpu.core_type<tc>, window_params = [{transform_indices = @transform_0, window_bounds = array<i64: 128, 256>}, {transform_indices = @transform_1, window_bounds = array<i64: 256, 16>}, {transform_indices = @transform_2, window_bounds = array<i64: 128, 16>}, {pipeline_mode = #tpu.pipeline_mode<synchronous>, transform_indices = @transform_3, window_bounds = array<i64: 16, 32>}, {pipeline_mode = #tpu.pipeline_mode<synchronous>, transform_indices = @transform_4, window_bounds = array<i64: 1, 32>}, {pipeline_mode = #tpu.pipeline_mode<synchronous>, transform_indices = @transform_5, window_bounds = array<i64: 16, 32>}, {transform_indices = @transform_6, window_bounds = array<i64: 128, 32>}, {transform_indices = @transform_7, window_bounds = array<i64: 128, 32>}]} {
    %c0_i32 = arith.constant 0 : i32
    %0 = arith.cmpi eq, %arg1, %c0_i32 : i32
    %1 = arith.extui %0 : i1 to i32
    %c0_i32_0 = arith.constant 0 : i32
    %2 = arith.cmpi ne, %1, %c0_i32_0 : i32
    scf.if %2 {
      %cst_10 = arith.constant 0.000000e+00 : f32
      %12 = vector.broadcast %cst_10 : f32 to vector<128x16xf32>
      %c0_11 = arith.constant 0 : index
      %c0_12 = arith.constant 0 : index
      %13 = vector.load %arg10[%c0_11, %c0_12] : memref<128x16xf32, #tpu.memory_space<vmem>>, vector<128x16xf32>
      tpu.vector_store %arg10[%c0_11, %c0_12], %12 {strides = array<i32>} : memref<128x16xf32, #tpu.memory_space<vmem>>, vector<128x16xf32>,
    } else {
    }
    %c0 = arith.constant 0 : index
    %c0_1 = arith.constant 0 : index
    %3 = vector.load %arg10[%c0, %c0_1] : memref<128x16xf32, #tpu.memory_space<vmem>>, vector<128x16xf32>
    %c0_2 = arith.constant 0 : index
    %c0_3 = arith.constant 0 : index
    %4 = vector.load %arg2[%c0_2, %c0_3] : memref<128x256xbf16, #tpu.memory_space<vmem>>, vector<128x256xbf16>
    %c0_4 = arith.constant 0 : index
    %c0_5 = arith.constant 0 : index
    %5 = vector.load %arg3[%c0_4, %c0_5] : memref<256x16xbf16, #tpu.memory_space<vmem>>, vector<256x16xbf16>
    %cst = arith.constant dense<0.000000e+00> : vector<128x16xf32>
    %6 = tpu.matmul %4, %5, %cst {dimension_numbers = #tpu.dot_dimension_numbers<[1], [0], [0], [1], [0, 0, 1, 1], [], []>} : vector<128x256xbf16>, vector<256x16xbf16>, vector<128x16xf32> -> vector<128x16xf32>
    %7 = arith.addf %3, %6 : vector<128x16xf32>
    %c0_6 = arith.constant 0 : index
    %c0_7 = arith.constant 0 : index
    %8 = vector.load %arg10[%c0_6, %c0_7] : memref<128x16xf32, #tpu.memory_space<vmem>>, vector<128x16xf32>
    tpu.vector_store %arg10[%c0_6, %c0_7], %7 {strides = array<i32>} : memref<128x16xf32, #tpu.memory_space<vmem>>, vector<128x16xf32>,
    %c0_i32_8 = arith.constant 0 : i32
    %9 = arith.cmpi eq, %arg1, %c0_i32_8 : i32
    %10 = arith.extui %9 : i1 to i32
    %c0_i32_9 = arith.constant 0 : i32
    %11 = arith.cmpi ne, %10, %c0_i32_9 : i32
    scf.if %11 {
      %c0_10 = arith.constant 0 : index
      %c0_11 = arith.constant 0 : index
      %12 = vector.load %arg10[%c0_10, %c0_11] : memref<128x16xf32, #tpu.memory_space<vmem>>, vector<128x16xf32>
      %c0_12 = arith.constant 0 : index
      %c0_13 = arith.constant 0 : index
      %13 = vector.load %arg5[%c0_12, %c0_13] : memref<16x32xf32, #tpu.memory_space<vmem>>, vector<16x32xf32>
      %cst_14 = arith.constant dense<0.000000e+00> : vector<128x32xf32>
      %14 = tpu.matmul %12, %13, %cst_14 {dimension_numbers = #tpu.dot_dimension_numbers<[1], [0], [0], [1], [0, 0, 1, 1], [], []>} : vector<128x16xf32>, vector<16x32xf32>, vector<128x32xf32> -> vector<128x32xf32>
      %c0_15 = arith.constant 0 : index
      %c0_16 = arith.constant 0 : index
      %15 = vector.load %arg6[%c0_15, %c0_16] : memref<1x32xf32, #tpu.memory_space<vmem>>, vector<1x32xf32>
      %16 = vector.broadcast %15 : vector<1x32xf32> to vector<128x32xf32>
      %17 = arith.addf %14, %16 : vector<128x32xf32>
      %cst_17 = arith.constant 0.000000e+00 : f32
      %18 = vector.broadcast %cst_17 : f32 to vector<128x32xf32>
      %19 = arith.maximumf %17, %18 : vector<128x32xf32>
      %20 = arith.truncf %19 : vector<128x32xf32> to vector<128x32xbf16>
      %c0_18 = arith.constant 0 : index
      %c0_19 = arith.constant 0 : index
      %21 = vector.load %arg8[%c0_18, %c0_19] : memref<128x32xbf16, #tpu.memory_space<vmem>>, vector<128x32xbf16>
      tpu.vector_store %arg8[%c0_18, %c0_19], %20 {strides = array<i32>} : memref<128x32xbf16, #tpu.memory_space<vmem>>, vector<128x32xbf16>,
      %c0_20 = arith.constant 0 : index
      %c0_21 = arith.constant 0 : index
      %22 = vector.load %arg4[%c0_20, %c0_21] : memref<128x16xf32, #tpu.memory_space<vmem>>, vector<128x16xf32>
      %c0_22 = arith.constant 0 : index
      %c0_23 = arith.constant 0 : index
      %23 = vector.load %arg7[%c0_22, %c0_23] : memref<16x32xf32, #tpu.memory_space<vmem>>, vector<16x32xf32>
      %cst_24 = arith.constant dense<0.000000e+00> : vector<128x32xf32>
      %24 = tpu.matmul %22, %23, %cst_24 {dimension_numbers = #tpu.dot_dimension_numbers<[1], [0], [0], [1], [0, 0, 1, 1], [], []>} : vector<128x16xf32>, vector<16x32xf32>, vector<128x32xf32> -> vector<128x32xf32>
      %c0_25 = arith.constant 0 : index
      %c0_26 = arith.constant 0 : index
      %25 = vector.load %arg9[%c0_25, %c0_26] : memref<128x32xf32, #tpu.memory_space<vmem>>, vector<128x32xf32>
      tpu.vector_store %arg9[%c0_25, %c0_26], %24 {strides = array<i32>} : memref<128x32xf32, #tpu.memory_space<vmem>>, vector<128x32xf32>,
    } else {
    }
    return
  }
  func.func @transform_0(%arg0: i32, %arg1: i32) -> (i32, i32) {
    %c0_i32 = arith.constant 0 : i32
    return %arg0, %arg1 : i32, i32
  }
  func.func @transform_1(%arg0: i32, %arg1: i32) -> (i32, i32) {
    %c0_i32 = arith.constant 0 : i32
    %c0_i32_0 = arith.constant 0 : i32
    return %arg1, %c0_i32 : i32, i32
  }
  func.func @transform_2(%arg0: i32, %arg1: i32) -> (i32, i32) {
    %c0_i32 = arith.constant 0 : i32
    %c0_i32_0 = arith.constant 0 : i32
    return %arg0, %c0_i32 : i32, i32
  }
  func.func @transform_3(%arg0: i32, %arg1: i32) -> (i32, i32) {
    %c0_i32 = arith.constant 0 : i32
    %c0_i32_0 = arith.constant 0 : i32
    %c0_i32_1 = arith.constant 0 : i32
    return %c0_i32, %c0_i32_0 : i32, i32
  }
  func.func @transform_4(%arg0: i32, %arg1: i32) -> (i32, i32) {
    %c0_i32 = arith.constant 0 : i32
    %c0_i32_0 = arith.constant 0 : i32
    %c0_i32_1 = arith.constant 0 : i32
    return %c0_i32, %c0_i32_0 : i32, i32
  }
  func.func @transform_5(%arg0: i32, %arg1: i32) -> (i32, i32) {
    %c0_i32 = arith.constant 0 : i32
    %c0_i32_0 = arith.constant 0 : i32
    %c0_i32_1 = arith.constant 0 : i32
    return %c0_i32, %c0_i32_0 : i32, i32
  }
  func.func @transform_6(%arg0: i32, %arg1: i32) -> (i32, i32) {
    %c0_i32 = arith.constant 0 : i32
    %c0_i32_0 = arith.constant 0 : i32
    return %arg0, %c0_i32 : i32, i32
  }
  func.func @transform_7(%arg0: i32, %arg1: i32) -> (i32, i32) {
    %c0_i32 = arith.constant 0 : i32
    %c0_i32_0 = arith.constant 0 : i32
    return %arg0, %c0_i32 : i32, i32
  }
}

</mosaic_0001>

<bundles_post_ra>
// kernel: tpu_custom_call.1
= control target key start
LH: loop header
LB: loop body
LE: loop exit
PB: predicated region body
PF: predicated region fallthrough
CT: control target
= control target key end

     0   :  { %s1850_s24 = smov 0   ;;  %s1852_s25 = smov 0   ;;  %s2147_s0 = inlined_call_operand.vmem [shape: bf16[256,256], index: 0, kind: input, shape index: {}]   ;;  %s2148_s1 = inlined_call_operand.vmem [shape: bf16[256,16], index: 1, kind: input, shape index: {}]   ;;  %s2149_s2 = inlined_call_operand.vmem [shape: f32[256,16], index: 2, kind: input, shape index: {}]   ;;  %s2150_s3 = inlined_call_operand.vmem [shape: f32[16,32], index: 3, kind: input, shape index: {}]   ;;  %s2151_s4 = inlined_call_operand.vmem [shape: f32[1,32], index: 4, kind: input, shape index: {}]   ;;  %s2152_s5 = inlined_call_operand.vmem [shape: f32[16,32], index: 5, kind: input, shape index: {}]   ;;  %s2153_s6 = inlined_call_operand.vmem [shape: bf16[256,32], index: 6, kind: output, shape index: {0}]   ;;  %s2154_s7 = inlined_call_operand.vmem [shape: f32[256,32], index: 7, kind: output, shape index: {1}]  }
   0x1   :  { %s1854_s26 = smov 0  }
   0x2 LB: > { %s30_s27 = sadd.s32 1, %s1803_s25  ;;  %p1446_p0 = scmp.ge.s32.totalorder %s1807_s26, 1  ;;  %s1807_s26 = sphi %s1854_s26, %s18_s26   ;;  %s1803_s25 = sphi %s1852_s25, %s2156_s25   ;;  %s1799_s24 = sphi %s1850_s24, %s2155_s24  }
   0x3   : > { %p32_p1 = scmp.ge.s32.totalorder %s30_s27, 2  ;;  %p283_p2 = scmp.lt.s32.totalorder %s1807_s26, 3 }
   0x5   : > { %s2158_s27 = smov (%p32_p1, %s30_s27), 0  ;;  %p284_p3 = pnand %p1446_p0, %p283_p2 }
   0x6   : > { %v1745_v0 = vld [vmem:[%s2148_s1 + $0x40] sm:$0xff] (!%p284_p3)   ;;  %s1447_s30 = sshll.u32 (!%p284_p3), %s1799_s24, 4  ;;  %v1747_v2 = vld [vmem:[%s2148_s1 + $0x48] sm:$0xff] (!%p284_p3)   ;;  %v1749_v4 = vld [vmem:[%s2148_s1 + $0x50] sm:$0xff] (!%p284_p3)   ;;  %vm376_vm0 = vcmask (!%p284_p3), 130048   ;;  %v1809_v32 = vmov (!%p284_p3), 0.0  }
   0x7   : > { %287 = sbr.rel (%p284_p3) target bundleno = 568 (0x238), region = 44  ;;  %v1746_v1 = vld [vmem:[%s2148_s1] sm:$0xff] (!%p284_p3)   ;;  %1556 = vmatprep.subr.bf16.mxu0 (!%p284_p3), %v1745_v0  ;;  %v1748_v3 = vld [vmem:[%s2148_s1 + $0x8] sm:$0xff] (!%p284_p3)   ;;  %p337_p4 = scmp.lt.s32.totalorder (!%p284_p3), %s1447_s30, 31  ;;  %v1750_v5 = vld [vmem:[%s2148_s1 + $0x10] sm:$0xff] (!%p284_p3)   ;;  %377 = vst.msk [vmem:[#allocation2] sm:$0xff] (!%p284_p3), %vm376_vm0, %v1809_v32 }
   0x8   : > { %1557 = vmatpush3.bf16.msra.mxu0 (!%p284_p3), %v1746_v1  ;;  %v1751_v6 = vld [vmem:[%s2148_s1 + $0x58] sm:$0xff] (!%p284_p3)   ;;  %v1753_v8 = vld [vmem:[%s2148_s1 + $0x60] sm:$0xff] (!%p284_p3)   ;;  %v1755_v10 = vld [vmem:[%s2148_s1 + $0x68] sm:$0xff] (!%p284_p3)   ;;  %378 = vst.msk [vmem:[#allocation2 + $0x8] sm:$0xff] (!%p284_p3), %vm376_vm0, %v1809_v32  ;;  %vm1064_vm1 = vcmask (!%p284_p3), 257024   ;;  %vm1292_vm2 = vcmask (!%p284_p3), 261120  }
   0x9   : > { %1558 = vmatprep.subr.bf16.mxu0 (!%p284_p3), %v1747_v2  ;;  %v1752_v7 = vld [vmem:[%s2148_s1 + $0x18] sm:$0xff] (!%p284_p3)   ;;  %v1754_v9 = vld [vmem:[%s2148_s1 + $0x20] sm:$0xff] (!%p284_p3)   ;;  %v1756_v12 = vld [vmem:[%s2148_s1 + $0x28] sm:$0xff] (!%p284_p3)   ;;  %379 = vst.msk [vmem:[#allocation2 + $0x10] sm:$0xff] (!%p284_p3), %vm376_vm0, %v1809_v32 }
   0xa   : > { %v1757_v13 = vld [vmem:[%s2148_s1 + $0x70] sm:$0xff] (!%p284_p3)   ;;  %v1759_v15 = vld [vmem:[%s2148_s1 + $0x78] sm:$0xff] (!%p284_p3)   ;;  %380 = vst.msk [vmem:[#allocation2 + $0x18] sm:$0xff] (!%p284_p3), %vm376_vm0, %v1809_v32  ;;  %381 = vst.msk [vmem:[#allocation2 + $0x20] sm:$0xff] (!%p284_p3), %vm376_vm0, %v1809_v32 }
   0xb   : > { %v1758_v14 = vld [vmem:[%s2148_s1 + $0x30] sm:$0xff] (!%p284_p3)   ;;  %v1760_v16 = vld [vmem:[%s2148_s1 + $0x38] sm:$0xff] (!%p284_p3)   ;;  %382 = vst.msk [vmem:[#allocation2 + $0x28] sm:$0xff] (!%p284_p3), %vm376_vm0, %v1809_v32  ;;  %383 = vst.msk [vmem:[#allocation2 + $0x30] sm:$0xff] (!%p284_p3), %vm376_vm0, %v1809_v32 }
   0xc   : > { %1559 = vmatpush3.bf16.msra.mxu0 (!%p284_p3), %v1748_v3  ;;  %384 = vst.msk [vmem:[#allocation2 + $0x38] sm:$0xff] (!%p284_p3), %vm376_vm0, %v1809_v32  ;;  %385 = vst.msk [vmem:[#allocation2 + $0x40] sm:$0xff] (!%p284_p3), %vm376_vm0, %v1809_v32  ;;  %v782_v33 = vld [vmem:[%s2150_s3] sm:$0xff] (!%p284_p3)  ;;  %v783_v34 = vld [vmem:[%s2150_s3 + $0x8] sm:$0xff] (!%p284_p3) }
   0xd   : > { %1560 = vmatprep.subr.bf16.mxu0 (!%p284_p3), %v1749_v4  ;;  %386 = vst.msk [vmem:[#allocation2 + $0x48] sm:$0xff] (!%p284_p3), %vm376_vm0, %v1809_v32  ;;  %387 = vst.msk [vmem:[#allocation2 + $0x50] sm:$0xff] (!%p284_p3), %vm376_vm0, %v1809_v32  ;;  %v1712_v35 = vpack.c.bf16 (!%p284_p3), %v783_v34, %v782_v33  ;;  %v1097_v36 = vld [vmem:[%s2152_s5] sm:$0xff] (!%p284_p3)  ;;  %v1098_v37 = vld [vmem:[%s2152_s5 + $0x8] sm:$0xff] (!%p284_p3) }
   0xe   : > { %s2160_s30 = smov (!%p337_p4, %s1447_s30), 31  ;;  %388 = vst.msk [vmem:[#allocation2 + $0x58] sm:$0xff] %vm376_vm0, %v1809_v32  ;;  %389 = vst.msk [vmem:[#allocation2 + $0x60] sm:$0xff] %vm376_vm0, %v1809_v32  ;;  %v1716_v38 = vpack.c.bf16 %v1098_v37, %v1097_v36  ;;  %v393_v40 = vld [vmem:[#allocation2] sm:$0xff] }
   0xf   : > { %s1895_s22 = sshll.u32 %s2160_s30, 3  ;;  %390 = vst.msk [vmem:[#allocation2 + $0x68] sm:$0xff] %vm376_vm0, %v1809_v32  ;;  %391 = vst.msk [vmem:[#allocation2 + $0x70] sm:$0xff] %vm376_vm0, %v1809_v32  ;;  %1713 = vmatprep.subr.bf16.mxu1 %v1712_v35  ;;  %v394_v44 = vld [vmem:[#allocation2 + $0x8] sm:$0xff]  ;;  %s1453_s18 = sshll.u32 %s2160_s30, 2 }
  0x10   : > { %1561 = vmatpush3.bf16.msra.mxu0 %v1750_v5  ;;  %s1904_s8 = scalar_lea.vmem %s2147_s0, %s1895_s22  ;;  %392 = vst.msk [vmem:[#allocation2 + $0x78] sm:$0xff] %vm376_vm0, %v1809_v32  ;;  %1715 = vmatpush3.bf16.msra.mxu1 %v1712_v35  ;;  %v395_v50 = vld [vmem:[#allocation2 + $0x10] sm:$0xff]  ;;  %s2005_s15 = scalar_lea.vmem %s2149_s2, %s1895_s22 }
  0x11   : > { %1562 = vmatprep.subr.bf16.mxu0 %v1751_v6  ;;  %v1763_v11 = vld [vmem:[%s1904_s8 + $0x4] ss:$8 sps:$4 sm:$0xff]   ;;  %v1761_v17 = vld [vmem:[%s1904_s8] ss:$8 sps:$4 sm:$0xff]   ;;  %v1764_v18 = vld [vmem:[%s1904_s8 + $0x14] ss:$8 sps:$4 sm:$0xff]   ;;  %1717 = vmatprep.subr.bf16.mxu1 %v1716_v38  ;;  %s2052_s21 = scalar_lea.vmem %s2153_s6, %s1453_s18  ;;  %s2100_s24 = scalar_lea.vmem %s2154_s7, %s1895_s22 }
  0x12   : > { %665 = vmatprep.mubr.bf16.mxu0 %v1763_v11  ;;  %v1766_v19 = vld [vmem:[%s1904_s8 + $0x10] ss:$8 sps:$4 sm:$0xff]   ;;  %v1767_v20 = vld [vmem:[%s1904_s8 + $0x24] ss:$8 sps:$4 sm:$0xff]   ;;  %v1769_v21 = vld [vmem:[%s1904_s8 + $0x20] ss:$8 sps:$4 sm:$0xff]  }
  0x13   : > { %v1770_v22 = vld [vmem:[%s1904_s8 + $0x34] ss:$8 sps:$4 sm:$0xff]   ;;  %v1772_v23 = vld [vmem:[%s1904_s8 + $0x30] ss:$8 sps:$4 sm:$0xff]   ;;  %v1773_v24 = vld [vmem:[%s1904_s8 + $0x44] ss:$8 sps:$4 sm:$0xff]  }
  0x14   : > { %1563 = vmatpush3.bf16.msra.mxu0 %v1752_v7  ;;  %v1775_v25 = vld [vmem:[%s1904_s8 + $0x40] ss:$8 sps:$4 sm:$0xff]   ;;  %v1776_v26 = vld [vmem:[%s1904_s8 + $0x54] ss:$8 sps:$4 sm:$0xff]   ;;  %v1778_v27 = vld [vmem:[%s1904_s8 + $0x50] ss:$8 sps:$4 sm:$0xff]  }
  0x15   : > { %1564 = vmatprep.subr.bf16.mxu0 %v1753_v8  ;;  %v1779_v28 = vld [vmem:[%s1904_s8 + $0x64] ss:$8 sps:$4 sm:$0xff]   ;;  %v1781_v29 = vld [vmem:[%s1904_s8 + $0x60] ss:$8 sps:$4 sm:$0xff]   ;;  %v1782_v30 = vld [vmem:[%s1904_s8 + $0x74] ss:$8 sps:$4 sm:$0xff]  }
  0x16   : > { %v1784_v31 = vld [vmem:[%s1904_s8 + $0x70] ss:$8 sps:$4 sm:$0xff]   ;;  %v397_v62 = vld [vmem:[#allocation2 + $0x20] sm:$0xff]  ;;  %v398_v2 = vld [vmem:[#allocation2 + $0x28] sm:$0xff] }
  0x17   : > { %v396_v54 = vld [vmem:[#allocation2 + $0x18] sm:$0xff]  ;;  %v403_v34 = vld [vmem:[#allocation2 + $0x50] sm:$0xff] }
  0x18   : > { %1565 = vmatpush3.bf16.msra.mxu0 %v1754_v9 }
  0x19   : > { %1566 = vmatprep.subr.bf16.mxu0 %v1755_v10  ;;  %v399_v10 = vld [vmem:[#allocation2 + $0x30] sm:$0xff] }
  0x1c   : > { %1567 = vmatpush3.bf16.msra.mxu0 %v1756_v12 }
  0x1d   : > { %1568 = vmatprep.subr.bf16.mxu0 %v1757_v13 }
  0x20   : > { %1569 = vmatpush3.bf16.msra.mxu0 %v1758_v14  ;;  %v400_v14 = vld [vmem:[#allocation2 + $0x38] sm:$0xff] }
  0x21   : > { %1570 = vmatprep.subr.bf16.mxu0 %v1759_v15 }
  0x24   : > { %1571 = vmatpush3.bf16.msra.mxu0 %v1760_v16 }
  0x27   : > { %666 = vmatmul.mubr.bf16.vlgmr.msra.gmra.mrb[0].mxu0 %v1761_v17 }
  0x28   : > { %673 = vmatprep.mubr.bf16.mxu0 %v1764_v18 }
  0x2f   : > { %674 = vmatmul.mubr.bf16.gmra.mrb[4].mxu0 %v1766_v19 }
  0x30   : > { %681 = vmatprep.mubr.bf16.mxu0 %v1767_v20 }
  0x37   : > { %682 = vmatmul.mubr.bf16.gmra.mrb[8].mxu0 %v1769_v21 }
  0x38   : > { %689 = vmatprep.mubr.bf16.mxu0 %v1770_v22  ;;  %v401_v22 = vld [vmem:[#allocation2 + $0x40] sm:$0xff] }
  0x3f   : > { %690 = vmatmul.mubr.bf16.gmra.mrb[12].mxu0 %v1772_v23 }
  0x40   : > { %697 = vmatprep.mubr.bf16.mxu0 %v1773_v24 }
  0x47   : > { %698 = vmatmul.mubr.bf16.gmra.mrb[16].mxu0 %v1775_v25 }
  0x48   : > { %705 = vmatprep.mubr.bf16.mxu0 %v1776_v26  ;;  %v402_v26 = vld [vmem:[#allocation2 + $0x48] sm:$0xff] }
  0x4f   : > { %706 = vmatmul.mubr.bf16.gmra.mrb[20].mxu0 %v1778_v27 }
  0x50   : > { %713 = vmatprep.mubr.bf16.mxu0 %v1779_v28 }
  0x57   : > { %714 = vmatmul.mubr.bf16.gmra.mrb[24].mxu0 %v1781_v29 }
  0x58   : > { %721 = vmatprep.mubr.bf16.mxu0 %v1782_v30 }
  0x5f   : > { %722 = vmatmul.mubr.bf16.gmra.mrb[28].mxu0 %v1784_v31 }
  0xfa   : > { %v1572_v39 = vpop.f32.mrb[0].mxu0 }
  0xfb   : > { %v1573_v41 = vpop.f32.mrb[1].mxu0 }
  0xfc   : > { %v1574_v42 = vadd.f32 %v1573_v41, %v1572_v39  ;;  %v1575_v43 = vpop.f32.mrb[2].mxu0 }
  0xfd   : > { %v1576_v45 = vpop.f32.mrb[3].mxu0 }
  0xfe   : > { %v730_v46 = vadd.f32 %v1574_v42, %v393_v40  ;;  %v1577_v47 = vadd.f32 %v1576_v45, %v1575_v43 }
 0x100   : > { %747 = vst.msk [vmem:[#allocation2] sm:$0xff] %vm376_vm0, %v730_v46  ;;  %v731_v48 = vadd.f32 %v1577_v47, %v394_v44  ;;  %v405_v46 = vld [vmem:[#allocation2 + $0x60] sm:$0xff] }
 0x102   : > { %748 = vst.msk [vmem:[#allocation2 + $0x8] sm:$0xff] %vm376_vm0, %v731_v48  ;;  %v1578_v49 = vpop.f32.mrb[4].mxu0 }
 0x103   : > { %v1579_v51 = vpop.f32.mrb[5].mxu0 }
 0x104   : > { %v1580_v52 = vadd.f32 %v1579_v51, %v1578_v49  ;;  %v1581_v53 = vpop.f32.mrb[6].mxu0 }
 0x105   : > { %v1582_v55 = vpop.f32.mrb[7].mxu0 }
 0x106   : > { %v732_v56 = vadd.f32 %v1580_v52, %v395_v50  ;;  %v1583_v57 = vadd.f32 %v1582_v55, %v1581_v53  ;;  %v406_v50 = vld [vmem:[#allocation2 + $0x68] sm:$0xff] }
 0x107   : > { %v766_v58 = vld [vmem:[#allocation2] sm:$0xff] }
 0x108   : > { %749 = vst.msk [vmem:[#allocation2 + $0x10] sm:$0xff] %vm376_vm0, %v732_v56  ;;  %v733_v59 = vadd.f32 %v1583_v57, %v396_v54  ;;  %1660 = vmatprep.mubr.msk.f32.mxu1 %vm376_vm0, %v766_v58  ;;  %v407_v58 = vld [vmem:[#allocation2 + $0x70] sm:$0xff] }
 0x109   : > { %v767_v60 = vld [vmem:[#allocation2 + $0x8] sm:$0xff] }
 0x10a   : > { %750 = vst.msk [vmem:[#allocation2 + $0x18] sm:$0xff] %vm376_vm0, %v733_v59  ;;  %v1584_v61 = vpop.f32.mrb[8].mxu0  ;;  %1661 = vmatmul.mubr.msk.f32.vlgmr.msra.gmra.mrb[0].mxu1 %vm376_vm0, %v767_v60 }
 0x10b   : > { %v1585_v63 = vpop.f32.mrb[9].mxu0  ;;  %1719 = vmatpush3.bf16.msra.mxu1 %v1716_v38  ;;  %v404_v38 = vld [vmem:[#allocation2 + $0x58] sm:$0xff] }
 0x10c   : > { %v1586_v0 = vadd.f32 %v1585_v63, %v1584_v61  ;;  %v1587_v1 = vpop.f32.mrb[10].mxu0 }
 0x10d   : > { %v1588_v3 = vpop.f32.mrb[11].mxu0 }
 0x10e   : > { %v734_v4 = vadd.f32 %v1586_v0, %v397_v62  ;;  %v1589_v5 = vadd.f32 %v1588_v3, %v1587_v1  ;;  %v408_v62 = vld [vmem:[#allocation2 + $0x78] sm:$0xff] }
 0x10f   : > { %v768_v6 = vld [vmem:[#allocation2 + $0x10] sm:$0xff] }
 0x110   : > { %751 = vst.msk [vmem:[#allocation2 + $0x20] sm:$0xff] %vm376_vm0, %v734_v4  ;;  %v735_v7 = vadd.f32 %v1589_v5, %v398_v2  ;;  %1663 = vmatprep.mubr.msk.f32.mxu1 %vm376_vm0, %v768_v6  ;;  %v1081_v6 = vld [vmem:[%s2005_s15] sm:$0xff] }
 0x111   : > { %v769_v8 = vld [vmem:[#allocation2 + $0x18] sm:$0xff] }
 0x112   : > { %752 = vst.msk [vmem:[#allocation2 + $0x28] sm:$0xff] %vm376_vm0, %v735_v7  ;;  %v1590_v9 = vpop.f32.mrb[12].mxu0  ;;  %1664 = vmatmul.mubr.msk.f32.gmra.mrb[2].mxu1 %vm376_vm0, %v769_v8  ;;  %v1082_v8 = vld [vmem:[%s2005_s15 + $0x8] sm:$0xff] }
 0x113   : > { %v1591_v11 = vpop.f32.mrb[13].mxu0 }
 0x114   : > { %v1592_v12 = vadd.f32 %v1591_v11, %v1590_v9  ;;  %v1593_v13 = vpop.f32.mrb[14].mxu0  ;;  %v1083_v9 = vld [vmem:[%s2005_s15 + $0x10] sm:$0xff]  ;;  %v1085_v11 = vld [vmem:[%s2005_s15 + $0x20] sm:$0xff] }
 0x115   : > { %v1594_v15 = vpop.f32.mrb[15].mxu0 }
 0x116   : > { %v736_v16 = vadd.f32 %v1592_v12, %v399_v10  ;;  %v1595_v17 = vadd.f32 %v1594_v15, %v1593_v13  ;;  %v1084_v10 = vld [vmem:[%s2005_s15 + $0x18] sm:$0xff]  ;;  %v1086_v12 = vld [vmem:[%s2005_s15 + $0x28] sm:$0xff]  ;;  %v1087_v13 = vld [vmem:[%s2005_s15 + $0x30] sm:$0xff] }
 0x117   : > { %v770_v18 = vld [vmem:[#allocation2 + $0x20] sm:$0xff] }
 0x118   : > { %753 = vst.msk [vmem:[#allocation2 + $0x30] sm:$0xff] %vm376_vm0, %v736_v16  ;;  %v737_v19 = vadd.f32 %v1595_v17, %v400_v14  ;;  %1666 = vmatprep.mubr.msk.f32.mxu1 %vm376_vm0, %v770_v18  ;;  %v1088_v14 = vld [vmem:[%s2005_s15 + $0x38] sm:$0xff]  ;;  %v1089_v15 = vld [vmem:[%s2005_s15 + $0x40] sm:$0xff]  ;;  %v1090_v16 = vld [vmem:[%s2005_s15 + $0x48] sm:$0xff] }
 0x119   : > { %v771_v20 = vld [vmem:[#allocation2 + $0x28] sm:$0xff]  ;;  %v1091_v17 = vld [vmem:[%s2005_s15 + $0x50] sm:$0xff]  ;;  %v1092_v18 = vld [vmem:[%s2005_s15 + $0x58] sm:$0xff] }
 0x11a   : > { %754 = vst.msk [vmem:[#allocation2 + $0x38] sm:$0xff] %vm376_vm0, %v737_v19  ;;  %v1596_v21 = vpop.f32.mrb[16].mxu0  ;;  %1667 = vmatmul.mubr.msk.f32.gmra.mrb[4].mxu1 %vm376_vm0, %v771_v20  ;;  %v1093_v19 = vld [vmem:[%s2005_s15 + $0x60] sm:$0xff]  ;;  %v1094_v20 = vld [vmem:[%s2005_s15 + $0x68] sm:$0xff] }
 0x11b   : > { %v1597_v23 = vpop.f32.mrb[17].mxu0 }
 0x11c   : > { %v1598_v24 = vadd.f32 %v1597_v23, %v1596_v21  ;;  %v1599_v25 = vpop.f32.mrb[18].mxu0  ;;  %v1095_v21 = vld [vmem:[%s2005_s15 + $0x70] sm:$0xff]  ;;  %v2044_v23 = vld [vmem:[%s2151_s4] ss:$0 sm:$0xff] }
 0x11d   : > { %v1600_v27 = vpop.f32.mrb[19].mxu0 }
 0x11e   : > { %v738_v28 = vadd.f32 %v1598_v24, %v401_v22  ;;  %v1601_v29 = vadd.f32 %v1600_v27, %v1599_v25  ;;  %v1096_v22 = vld [vmem:[%s2005_s15 + $0x78] sm:$0xff] }
 0x11f   : > { %v772_v30 = vld [vmem:[#allocation2 + $0x30] sm:$0xff] }
 0x120   : > { %755 = vst.msk [vmem:[#allocation2 + $0x40] sm:$0xff] %vm376_vm0, %v738_v28  ;;  %v739_v31 = vadd.f32 %v1601_v29, %v402_v26  ;;  %1669 = vmatprep.mubr.msk.f32.mxu1 %vm376_vm0, %v772_v30 }
 0x121   : > { %v773_v32 = vld [vmem:[#allocation2 + $0x38] sm:$0xff] }
 0x122   : > { %756 = vst.msk [vmem:[#allocation2 + $0x48] sm:$0xff] %vm376_vm0, %v739_v31  ;;  %v1602_v33 = vpop.f32.mrb[20].mxu0  ;;  %1670 = vmatmul.mubr.msk.f32.gmra.mrb[6].mxu1 %vm376_vm0, %v773_v32 }
 0x123   : > { %v1603_v35 = vpop.f32.mrb[21].mxu0 }
 0x124   : > { %v1604_v36 = vadd.f32 %v1603_v35, %v1602_v33  ;;  %v1605_v37 = vpop.f32.mrb[22].mxu0 }
 0x125   : > { %v1606_v39 = vpop.f32.mrb[23].mxu0 }
 0x126   : > { %v740_v40 = vadd.f32 %v1604_v36, %v403_v34  ;;  %v1607_v41 = vadd.f32 %v1606_v39, %v1605_v37 }
 0x127   : > { %v774_v42 = vld [vmem:[#allocation2 + $0x40] sm:$0xff] }
 0x128   : > { %757 = vst.msk [vmem:[#allocation2 + $0x50] sm:$0xff] %vm376_vm0, %v740_v40  ;;  %v741_v43 = vadd.f32 %v1607_v41, %v404_v38  ;;  %1672 = vmatprep.mubr.msk.f32.mxu1 %vm376_vm0, %v774_v42 }
 0x129   : > { %v775_v44 = vld [vmem:[#allocation2 + $0x48] sm:$0xff] }
 0x12a   : > { %758 = vst.msk [vmem:[#allocation2 + $0x58] sm:$0xff] %vm376_vm0, %v741_v43  ;;  %v1608_v45 = vpop.f32.mrb[24].mxu0  ;;  %1673 = vmatmul.mubr.msk.f32.gmra.mrb[8].mxu1 %vm376_vm0, %v775_v44 }
 0x12b   : > { %v1609_v47 = vpop.f32.mrb[25].mxu0 }
 0x12c   : > { %v1610_v48 = vadd.f32 %v1609_v47, %v1608_v45  ;;  %v1611_v49 = vpop.f32.mrb[26].mxu0 }
 0x12d   : > { %v1612_v51 = vpop.f32.mrb[27].mxu0 }
 0x12e   : > { %v742_v52 = vadd.f32 %v1610_v48, %v405_v46  ;;  %v1613_v53 = vadd.f32 %v1612_v51, %v1611_v49 }
 0x12f   : > { %v776_v54 = vld [vmem:[#allocation2 + $0x50] sm:$0xff] }
 0x130   : > { %759 = vst.msk [vmem:[#allocation2 + $0x60] sm:$0xff] %vm376_vm0, %v742_v52  ;;  %v743_v55 = vadd.f32 %v1613_v53, %v406_v50  ;;  %1675 = vmatprep.mubr.msk.f32.mxu1 %vm376_vm0, %v776_v54 }
 0x131   : > { %v777_v56 = vld [vmem:[#allocation2 + $0x58] sm:$0xff] }
 0x132   : > { %760 = vst.msk [vmem:[#allocation2 + $0x68] sm:$0xff] %vm376_vm0, %v743_v55  ;;  %v1614_v57 = vpop.f32.mrb[28].mxu0  ;;  %1676 = vmatmul.mubr.msk.f32.gmra.mrb[10].mxu1 %vm376_vm0, %v777_v56 }
 0x133   : > { %v1615_v59 = vpop.f32.mrb[29].mxu0 }
 0x134   : > { %v1616_v60 = vadd.f32 %v1615_v59, %v1614_v57  ;;  %v1617_v61 = vpop.f32.mrb[30].mxu0 }
 0x135   : > { %v1618_v63 = vpop.f32.mrb[31].mxu0 }
 0x136   : > { %v744_v0 = vadd.f32 %v1616_v60, %v407_v58  ;;  %v1619_v1 = vadd.f32 %v1618_v63, %v1617_v61 }
 0x137   : > { %v778_v2 = vld [vmem:[#allocation2 + $0x60] sm:$0xff] }
 0x138   : > { %761 = vst.msk [vmem:[#allocation2 + $0x70] sm:$0xff] %vm376_vm0, %v744_v0  ;;  %v745_v3 = vadd.f32 %v1619_v1, %v408_v62  ;;  %1678 = vmatprep.mubr.msk.f32.mxu1 %vm376_vm0, %v778_v2 }
 0x139   : > { %v779_v4 = vld [vmem:[#allocation2 + $0x68] sm:$0xff] }
 0x13a   : > { %762 = vst.msk [vmem:[#allocation2 + $0x78] sm:$0xff] %vm376_vm0, %v745_v3  ;;  %1679 = vmatmul.mubr.msk.f32.gmra.mrb[12].mxu1 %vm376_vm0, %v779_v4 }
 0x13f   : > { %v780_v5 = vld [vmem:[#allocation2 + $0x70] sm:$0xff] }
 0x140   : > { %1681 = vmatprep.mubr.msk.f32.mxu1 %vm376_vm0, %v780_v5 }
 0x141   : > { %v781_v7 = vld [vmem:[#allocation2 + $0x78] sm:$0xff] }
 0x142   : > { %1682 = vmatmul.mubr.msk.f32.gmra.mrb[14].mxu1 %vm376_vm0, %v781_v7 }
 0x143   : > { %1688 = vmatprep.mubr.msk.f32.mxu1 %vm376_vm0, %v1081_v6 }
 0x146   : > { %1689 = vmatmul.mubr.msk.f32.vlgmr.msra.gmra.mrb[16].mxu1 %vm376_vm0, %v1082_v8 }
 0x147   : > { %1691 = vmatprep.mubr.msk.f32.mxu1 %vm376_vm0, %v1083_v9 }
 0x14a   : > { %1692 = vmatmul.mubr.msk.f32.gmra.mrb[18].mxu1 %vm376_vm0, %v1084_v10 }
 0x14b   : > { %1694 = vmatprep.mubr.msk.f32.mxu1 %vm376_vm0, %v1085_v11 }
 0x14e   : > { %1695 = vmatmul.mubr.msk.f32.gmra.mrb[20].mxu1 %vm376_vm0, %v1086_v12 }
 0x14f   : > { %1697 = vmatprep.mubr.msk.f32.mxu1 %vm376_vm0, %v1087_v13 }
 0x152   : > { %1698 = vmatmul.mubr.msk.f32.gmra.mrb[22].mxu1 %vm376_vm0, %v1088_v14 }
 0x153   : > { %1700 = vmatprep.mubr.msk.f32.mxu1 %vm376_vm0, %v1089_v15 }
 0x156   : > { %1701 = vmatmul.mubr.msk.f32.gmra.mrb[24].mxu1 %vm376_vm0, %v1090_v16 }
 0x157   : > { %1703 = vmatprep.mubr.msk.f32.mxu1 %vm376_vm0, %v1091_v17 }
 0x15a   : > { %1704 = vmatmul.mubr.msk.f32.gmra.mrb[26].mxu1 %vm376_vm0, %v1092_v18 }
 0x15b   : > { %1706 = vmatprep.mubr.msk.f32.mxu1 %vm376_vm0, %v1093_v19 }
 0x15e   : > { %1707 = vmatmul.mubr.msk.f32.gmra.mrb[28].mxu1 %vm376_vm0, %v1094_v20 }
 0x15f   : > { %1709 = vmatprep.mubr.msk.f32.mxu1 %vm376_vm0, %v1095_v21 }
 0x162   : > { %1710 = vmatmul.mubr.msk.f32.gmra.mrb[30].mxu1 %vm376_vm0, %v1096_v22 }
 0x1dd   : > { %v1662_v24 = vpop.f32.mrb[0].mxu1 }
 0x1de   : > { %v911_v25 = vadd.f32 %v1662_v24, %v2044_v23  ;;  %v905_v26 = vpop.f32.mrb[1].mxu1 }
 0x1df   : > { %v906_v27 = vadd.f32 %v2044_v23, %v905_v26 }
 0x1e0   : > { %v985_v28 = vmax.f32 %v911_v25, 0.0 }
 0x1e1   : > { %v984_v29 = vmax.f32 %v906_v27, 0.0 }
 0x1e2   : > { %v1541_v30 = vpack.c.bf16 %v985_v28, %v985_v28 }
 0x1e3   : > { %v1540_v31 = vpack.c.bf16 %v984_v29, %v984_v29 }
 0x1e4   : > { %1066 = vst.msk [vmem:[%s2052_s21 + $0x4] sm:$0xf] %vm1064_vm1, %v1541_v30 }
 0x1e5   : > { %1065 = vst.msk [vmem:[%s2052_s21] sm:$0xf] %vm1064_vm1, %v1540_v31  ;;  %v1665_v32 = vpop.f32.mrb[2].mxu1 }
 0x1e6   : > { %v921_v33 = vadd.f32 %v1665_v32, %v2044_v23  ;;  %v915_v34 = vpop.f32.mrb[3].mxu1 }
 0x1e7   : > { %v916_v35 = vadd.f32 %v2044_v23, %v915_v34 }
 0x1e8   : > { %v987_v36 = vmax.f32 %v921_v33, 0.0 }
 0x1e9   : > { %v986_v37 = vmax.f32 %v916_v35, 0.0 }
 0x1ea   : > { %v1543_v38 = vpack.c.bf16 %v987_v36, %v987_v36 }
 0x1eb   : > { %v1542_v39 = vpack.c.bf16 %v986_v37, %v986_v37 }
 0x1ec   : > { %1068 = vst.msk [vmem:[%s2052_s21 + $0xc] sm:$0xf] %vm1064_vm1, %v1543_v38 }
 0x1ed   : > { %1067 = vst.msk [vmem:[%s2052_s21 + $0x8] sm:$0xf] %vm1064_vm1, %v1542_v39  ;;  %v1668_v40 = vpop.f32.mrb[4].mxu1 }
 0x1ee   : > { %v931_v41 = vadd.f32 %v1668_v40, %v2044_v23  ;;  %v925_v42 = vpop.f32.mrb[5].mxu1 }
 0x1ef   : > { %v926_v43 = vadd.f32 %v2044_v23, %v925_v42 }
 0x1f0   : > { %v989_v44 = vmax.f32 %v931_v41, 0.0 }
 0x1f1   : > { %v988_v45 = vmax.f32 %v926_v43, 0.0 }
 0x1f2   : > { %v1545_v46 = vpack.c.bf16 %v989_v44, %v989_v44 }
 0x1f3   : > { %v1544_v47 = vpack.c.bf16 %v988_v45, %v988_v45 }
 0x1f4   : > { %1070 = vst.msk [vmem:[%s2052_s21 + $0x14] sm:$0xf] %vm1064_vm1, %v1545_v46 }
 0x1f5   : > { %1069 = vst.msk [vmem:[%s2052_s21 + $0x10] sm:$0xf] %vm1064_vm1, %v1544_v47  ;;  %v1671_v48 = vpop.f32.mrb[6].mxu1 }
 0x1f6   : > { %v941_v49 = vadd.f32 %v1671_v48, %v2044_v23  ;;  %v935_v50 = vpop.f32.mrb[7].mxu1 }
 0x1f7   : > { %v936_v51 = vadd.f32 %v2044_v23, %v935_v50 }
 0x1f8   : > { %v991_v52 = vmax.f32 %v941_v49, 0.0 }
 0x1f9   : > { %v990_v53 = vmax.f32 %v936_v51, 0.0 }
 0x1fa   : > { %v1547_v54 = vpack.c.bf16 %v991_v52, %v991_v52 }
 0x1fb   : > { %v1546_v55 = vpack.c.bf16 %v990_v53, %v990_v53 }
 0x1fc   : > { %1072 = vst.msk [vmem:[%s2052_s21 + $0x1c] sm:$0xf] %vm1064_vm1, %v1547_v54 }
 0x1fd   : > { %1071 = vst.msk [vmem:[%s2052_s21 + $0x18] sm:$0xf] %vm1064_vm1, %v1546_v55  ;;  %v1674_v56 = vpop.f32.mrb[8].mxu1 }
 0x1fe   : > { %v951_v57 = vadd.f32 %v1674_v56, %v2044_v23  ;;  %v945_v58 = vpop.f32.mrb[9].mxu1 }
 0x1ff   : > { %v946_v59 = vadd.f32 %v2044_v23, %v945_v58 }
 0x200   : > { %v993_v60 = vmax.f32 %v951_v57, 0.0 }
 0x201   : > { %v992_v61 = vmax.f32 %v946_v59, 0.0 }
 0x202   : > { %v1549_v62 = vpack.c.bf16 %v993_v60, %v993_v60 }
 0x203   : > { %v1548_v63 = vpack.c.bf16 %v992_v61, %v992_v61 }
 0x204   : > { %1074 = vst.msk [vmem:[%s2052_s21 + $0x24] sm:$0xf] %vm1064_vm1, %v1549_v62 }
 0x205   : > { %1073 = vst.msk [vmem:[%s2052_s21 + $0x20] sm:$0xf] %vm1064_vm1, %v1548_v63  ;;  %v1677_v0 = vpop.f32.mrb[10].mxu1 }
 0x206   : > { %v961_v1 = vadd.f32 %v1677_v0, %v2044_v23  ;;  %v955_v2 = vpop.f32.mrb[11].mxu1 }
 0x207   : > { %v956_v3 = vadd.f32 %v2044_v23, %v955_v2 }
 0x208   : > { %v995_v4 = vmax.f32 %v961_v1, 0.0 }
 0x209   : > { %v994_v5 = vmax.f32 %v956_v3, 0.0 }
 0x20a   : > { %v1551_v6 = vpack.c.bf16 %v995_v4, %v995_v4 }
 0x20b   : > { %v1550_v7 = vpack.c.bf16 %v994_v5, %v994_v5 }
 0x20c   : > { %1076 = vst.msk [vmem:[%s2052_s21 + $0x2c] sm:$0xf] %vm1064_vm1, %v1551_v6 }
 0x20d   : > { %1075 = vst.msk [vmem:[%s2052_s21 + $0x28] sm:$0xf] %vm1064_vm1, %v1550_v7  ;;  %v1680_v8 = vpop.f32.mrb[12].mxu1 }
 0x20e   : > { %v971_v9 = vadd.f32 %v1680_v8, %v2044_v23  ;;  %v965_v10 = vpop.f32.mrb[13].mxu1 }
 0x20f   : > { %v966_v11 = vadd.f32 %v2044_v23, %v965_v10 }
 0x210   : > { %v997_v12 = vmax.f32 %v971_v9, 0.0 }
 0x211   : > { %v996_v13 = vmax.f32 %v966_v11, 0.0 }
 0x212   : > { %v1553_v14 = vpack.c.bf16 %v997_v12, %v997_v12 }
 0x213   : > { %v1552_v15 = vpack.c.bf16 %v996_v13, %v996_v13 }
 0x214   : > { %1078 = vst.msk [vmem:[%s2052_s21 + $0x34] sm:$0xf] %vm1064_vm1, %v1553_v14 }
 0x215   : > { %1077 = vst.msk [vmem:[%s2052_s21 + $0x30] sm:$0xf] %vm1064_vm1, %v1552_v15  ;;  %v1683_v16 = vpop.f32.mrb[14].mxu1 }
 0x216   : > { %v981_v17 = vadd.f32 %v1683_v16, %v2044_v23  ;;  %v975_v18 = vpop.f32.mrb[15].mxu1 }
 0x217   : > { %v976_v19 = vadd.f32 %v2044_v23, %v975_v18 }
 0x218   : > { %v999_v20 = vmax.f32 %v981_v17, 0.0 }
 0x219   : > { %v998_v21 = vmax.f32 %v976_v19, 0.0  ;;  %v1690_v22 = vpop.f32.mrb[16].mxu1 }
 0x21a   : > { %v1555_v24 = vpack.c.bf16 %v999_v20, %v999_v20  ;;  %1294 = vst.msk [vmem:[%s2100_s24 + $0x8] sm:$0xff] %vm1292_vm2, %v1690_v22  ;;  %v1213_v23 = vpop.f32.mrb[17].mxu1 }
 0x21b   : > { %v1554_v25 = vpack.c.bf16 %v998_v21, %v998_v21  ;;  %1293 = vst.msk [vmem:[%s2100_s24] sm:$0xff] %vm1292_vm2, %v1213_v23 }
 0x21c   : > { %1080 = vst.msk [vmem:[%s2052_s21 + $0x3c] sm:$0xf] %vm1064_vm1, %v1555_v24 }
 0x21d   : > { %1079 = vst.msk [vmem:[%s2052_s21 + $0x38] sm:$0xf] %vm1064_vm1, %v1554_v25  ;;  %v1693_v26 = vpop.f32.mrb[18].mxu1 }
 0x21e   : > { %1296 = vst.msk [vmem:[%s2100_s24 + $0x18] sm:$0xff] %vm1292_vm2, %v1693_v26  ;;  %v1223_v27 = vpop.f32.mrb[19].mxu1 }
 0x21f   : > { %1295 = vst.msk [vmem:[%s2100_s24 + $0x10] sm:$0xff] %vm1292_vm2, %v1223_v27 }
 0x221   : > { %v1696_v28 = vpop.f32.mrb[20].mxu1 }
 0x222   : > { %1298 = vst.msk [vmem:[%s2100_s24 + $0x28] sm:$0xff] %vm1292_vm2, %v1696_v28  ;;  %v1233_v29 = vpop.f32.mrb[21].mxu1 }
 0x223   : > { %1297 = vst.msk [vmem:[%s2100_s24 + $0x20] sm:$0xff] %vm1292_vm2, %v1233_v29 }
 0x225   : > { %v1699_v30 = vpop.f32.mrb[22].mxu1 }
 0x226   : > { %1300 = vst.msk [vmem:[%s2100_s24 + $0x38] sm:$0xff] %vm1292_vm2, %v1699_v30  ;;  %v1243_v31 = vpop.f32.mrb[23].mxu1 }
 0x227   : > { %1299 = vst.msk [vmem:[%s2100_s24 + $0x30] sm:$0xff] %vm1292_vm2, %v1243_v31 }
 0x229   : > { %v1702_v32 = vpop.f32.mrb[24].mxu1 }
 0x22a   : > { %1302 = vst.msk [vmem:[%s2100_s24 + $0x48] sm:$0xff] %vm1292_vm2, %v1702_v32  ;;  %v1253_v33 = vpop.f32.mrb[25].mxu1 }
 0x22b   : > { %1301 = vst.msk [vmem:[%s2100_s24 + $0x40] sm:$0xff] %vm1292_vm2, %v1253_v33 }
 0x22d   : > { %v1705_v34 = vpop.f32.mrb[26].mxu1 }
 0x22e   : > { %1304 = vst.msk [vmem:[%s2100_s24 + $0x58] sm:$0xff] %vm1292_vm2, %v1705_v34  ;;  %v1263_v35 = vpop.f32.mrb[27].mxu1 }
 0x22f   : > { %1303 = vst.msk [vmem:[%s2100_s24 + $0x50] sm:$0xff] %vm1292_vm2, %v1263_v35 }
 0x231   : > { %v1708_v36 = vpop.f32.mrb[28].mxu1 }
 0x232   : > { %1306 = vst.msk [vmem:[%s2100_s24 + $0x68] sm:$0xff] %vm1292_vm2, %v1708_v36  ;;  %v1273_v37 = vpop.f32.mrb[29].mxu1 }
 0x233   : > { %1305 = vst.msk [vmem:[%s2100_s24 + $0x60] sm:$0xff] %vm1292_vm2, %v1273_v37 }
 0x235   : > { %v1711_v38 = vpop.f32.mrb[30].mxu1 }
 0x236   : > { %1308 = vst.msk [vmem:[%s2100_s24 + $0x78] sm:$0xff] %vm1292_vm2, %v1711_v38  ;;  %v1283_v39 = vpop.f32.mrb[31].mxu1 }
 0x237   : > { %1307 = vst.msk [vmem:[%s2100_s24 + $0x70] sm:$0xff] %vm1292_vm2, %v1283_v39 }
 0x238 PF: > { %s18_s26 = sadd.s32 1, %s1807_s26   ;;  %s2155_s24 = smov %s1803_s25 }
 0x239   : > { %p15_p5 = scmp.ge.s32.totalorder %s18_s26, 4   ;;  %s2156_s25 = smov %s2158_s27 }
 0x23b   :  { %17 = sbr.rel (!%p15_p5) target bundleno = 2 (0x2), region = 100 }

</bundles_post_ra>
